<compile_context>
chip_gen: v5e
topology: v5e:2x2
jax: 0.10.0
libtpu: 0.0.40
codegen_flags: <defaults>
</compile_context>

<pallas_src>
import functools

import jax
import jax.numpy as jnp
import numpy as np
from jax.experimental import pallas as pl
from jax.experimental.pallas import tpu as pltpu


# ---------------------------------------------------------------------------
# Pass 1: fused im2col-matmul convolution + on-the-fly per-channel statistics.
#   p_ref    : (TM, K)   im2col patch tile, K = 9*Cin
#   w_ref    : (K, CP)   weights, CP = Cout padded to a multiple of 128
#   conv_ref : (TM, CP)  unnormalized conv output tile (f32)
#   stats_ref: (2, CP)   row 0 = sum, row 1 = sum of squares (accumulated
#                        across the whole grid; "arbitrary" reduction axis)
# ---------------------------------------------------------------------------
def conv_stats_kernel(p_ref, w_ref, conv_ref, stats_ref):
    i = pl.program_id(0)

    acc = jnp.dot(p_ref[...], w_ref[...], preferred_element_type=jnp.float32)
    conv_ref[...] = acc

    @pl.when(i == 0)
    def _():
        stats_ref[...] = jnp.zeros_like(stats_ref)

    s = jnp.sum(acc, axis=0, keepdims=True)          # (1, CP)
    sq = jnp.sum(acc * acc, axis=0, keepdims=True)   # (1, CP)
    stats_ref[...] += jnp.concatenate([s, sq], axis=0)


# ---------------------------------------------------------------------------
# Pass 2: BatchNorm (from the accumulated stats) + ReLU, per tile.
# ---------------------------------------------------------------------------
def bn_relu_kernel(conv_ref, stats_ref, gamma_ref, beta_ref, o_ref, *,
                   inv_count, eps):
    mean = stats_ref[0:1, :] * inv_count
    var = stats_ref[1:2, :] * inv_count - mean * mean
    inv = jax.lax.rsqrt(var + eps)
    scale = gamma_ref[...] * inv                     # (1, CP)
    shift = beta_ref[...] - mean * scale             # (1, CP)
    y = conv_ref[...] * scale + shift
    o_ref[...] = jnp.maximum(y, 0.0).astype(o_ref.dtype)


def conv_bn_relu(x_nchw, w_oihw, bias, gamma, beta, *, eps=1e-5, tm=256):
    """ConvBNRelu forward (module default stride=1)."""
    # TODO(synk): stride != 1 not implemented (module default stride=1 used).
    # The conv bias is mathematically cancelled by training-mode BatchNorm's
    # mean subtraction, so it is intentionally unused (saves VPU work).
    del bias
    assert tm % 8 == 0

    N, Cin, H, W = x_nchw.shape
    Cout = w_oihw.shape[0]
    K = 9 * Cin
    CP = ((Cout + 127) // 128) * 128                 # lane-dense channel dim
    M = N * H * W

    # NHWC + spatial padding (padding=1).
    x = jnp.transpose(x_nchw, (0, 2, 3, 1)).astype(jnp.float32)
    xp = jnp.pad(x, ((0, 0), (1, 1), (1, 1), (0, 0)))

    # im2col: (M, 9*Cin). Column order (kh, kw, cin) matches the weight reshape.
    cols = [xp[:, kh:kh + H, kw:kw + W, :] for kh in range(3) for kw in range(3)]
    patches = jnp.concatenate(cols, axis=-1).reshape(M, K)

    # Pad M so M_pad % tm == 0.  Zero-padded rows contribute exactly 0 to sum
    # and sum-of-squares, so batch statistics (computed with the true count M)
    # stay exact; padded output rows are sliced away below.
    M_pad = ((M + tm - 1) // tm) * tm
    if M_pad != M:
        patches = jnp.pad(patches, ((0, M_pad - M), (0, 0)))

    # Weights (Cout,Cin,3,3) -> (3,3,Cin,Cout) -> (9*Cin, Cout) -> pad to CP.
    w = jnp.transpose(w_oihw, (2, 3, 1, 0)).reshape(K, Cout).astype(jnp.float32)
    w = jnp.pad(w, ((0, 0), (0, CP - Cout)))
    g = jnp.pad(gamma.reshape(1, Cout).astype(jnp.float32),
                ((0, 0), (0, CP - Cout)))
    b = jnp.pad(beta.reshape(1, Cout).astype(jnp.float32),
                ((0, 0), (0, CP - Cout)))

    n_tiles = M_pad // tm
    vmem_limit = 48 * 1024 * 1024   # sized against v7x's 64 MiB VMEM

    # ---- Pass 1: conv + stats ---------------------------------------------
    conv, stats = pl.pallas_call(
        conv_stats_kernel,
        out_shape=(jax.ShapeDtypeStruct((M_pad, CP), jnp.float32),
                   jax.ShapeDtypeStruct((2, CP), jnp.float32)),
        grid_spec=pltpu.PrefetchScalarGridSpec(
            num_scalar_prefetch=0,
            grid=(n_tiles,),
            in_specs=[pl.BlockSpec((tm, K), lambda i: (i, 0)),
                      pl.BlockSpec((K, CP), lambda i: (0, 0))],
            out_specs=[pl.BlockSpec((tm, CP), lambda i: (i, 0)),
                       pl.BlockSpec((2, CP), lambda i: (0, 0))]),
        compiler_params=pltpu.CompilerParams(
            dimension_semantics=("arbitrary",),   # stats = cross-tile reduction
            vmem_limit_bytes=vmem_limit),
    )(patches, w)

    # ---- Pass 2: BatchNorm + ReLU -----------------------------------------
    out_flat = pl.pallas_call(
        functools.partial(bn_relu_kernel, inv_count=1.0 / M, eps=eps),
        out_shape=jax.ShapeDtypeStruct((M_pad, CP), x_nchw.dtype),
        grid_spec=pltpu.PrefetchScalarGridSpec(
            num_scalar_prefetch=0,
            grid=(n_tiles,),
            in_specs=[pl.BlockSpec((tm, CP), lambda i: (i, 0)),
                      pl.BlockSpec((2, CP), lambda i: (0, 0)),
                      pl.BlockSpec((1, CP), lambda i: (0, 0)),
                      pl.BlockSpec((1, CP), lambda i: (0, 0))],
            out_specs=pl.BlockSpec((tm, CP), lambda i: (i, 0))),
        compiler_params=pltpu.CompilerParams(
            dimension_semantics=("parallel",),    # independent tiles -> 2 TCs on v7x
            vmem_limit_bytes=vmem_limit),
    )(conv, stats, g, b)

    out = out_flat[:M, :Cout].reshape(N, H, W, Cout)
    return jnp.transpose(out, (0, 3, 1, 2))          # back to NCHW


def reference(x_nchw, w_oihw, bias, gamma, beta, eps=1e-5):
    conv = jax.lax.conv_general_dilated(
        x_nchw, w_oihw, window_strides=(1, 1), padding=((1, 1), (1, 1)),
        dimension_numbers=("NCHW", "OIHW", "NCHW"))
    conv = conv + bias.reshape(1, -1, 1, 1)
    mean = jnp.mean(conv, axis=(0, 2, 3), keepdims=True)
    var = jnp.mean(jnp.square(conv - mean), axis=(0, 2, 3), keepdims=True)
    y = (conv - mean) * jax.lax.rsqrt(var + eps)
    y = y * gamma.reshape(1, -1, 1, 1) + beta.reshape(1, -1, 1, 1)
    return jnp.maximum(y, 0.0)


if __name__ == "__main__":
    N, Cin, Cout, H, W = 2, 4, 8, 16, 16

    key = jax.random.PRNGKey(0)
    kx, kw, kb, kg, kbe = jax.random.split(key, 5)

    # Deterministic parameter init (shapes match nn.Conv2d(Cin, Cout, 3) +
    # nn.BatchNorm2d(Cout)).
    bound = 1.0 / np.sqrt(Cin * 3 * 3)
    w_oihw = jax.random.uniform(kw, (Cout, Cin, 3, 3), jnp.float32,
                                minval=-bound, maxval=bound)
    bias = jax.random.uniform(kb, (Cout,), jnp.float32,
                              minval=-bound, maxval=bound)
    gamma = 1.0 + 0.1 * jax.random.normal(kg, (Cout,), jnp.float32)
    beta = 0.1 * jax.random.normal(kbe, (Cout,), jnp.float32)

    x = jax.random.normal(kx, (N, Cin, H, W), jnp.float32)

    out = conv_bn_relu(x, w_oihw, bias, gamma, beta)
    out = jax.block_until_ready(out)

    ref = jax.block_until_ready(reference(x, w_oihw, bias, gamma, beta))
    max_err = float(jnp.max(jnp.abs(out - ref)))
    assert out.shape == (N, Cout, H, W), out.shape
    assert max_err < 1e-4, f"max_err={max_err}"

    print("KERNEL_OK")
</pallas_src>

<mosaic_0001>
module attributes {stable_mosaic.version = 11 : i64} {
  func.func @conv_stats_kernel(%arg0: i32, %arg1: memref<256x36xf32, #tpu.memory_space<vmem>>, %arg2: memref<36x128xf32, #tpu.memory_space<vmem>>, %arg3: memref<256x128xf32, #tpu.memory_space<vmem>>, %arg4: memref<2x128xf32, #tpu.memory_space<vmem>>) attributes {dimension_semantics = [#tpu.dimension_semantics<arbitrary>], iteration_bounds = array<i64: 2>, scalar_prefetch = 0 : i64, scratch_operands = 0 : i64, tpu.core_type = #tpu.core_type<tc>, window_params = [{transform_indices = @transform_0, window_bounds = array<i64: 256, 36>}, {pipeline_mode = #tpu.pipeline_mode<synchronous>, transform_indices = @transform_1, window_bounds = array<i64: 36, 128>}, {transform_indices = @transform_2, window_bounds = array<i64: 256, 128>}, {pipeline_mode = #tpu.pipeline_mode<synchronous>, transform_indices = @transform_3, window_bounds = array<i64: 2, 128>}]} {
    %c0 = arith.constant 0 : index
    %c0_0 = arith.constant 0 : index
    %0 = vector.load %arg1[%c0, %c0_0] : memref<256x36xf32, #tpu.memory_space<vmem>>, vector<256x36xf32>
    %c0_1 = arith.constant 0 : index
    %c0_2 = arith.constant 0 : index
    %1 = vector.load %arg2[%c0_1, %c0_2] : memref<36x128xf32, #tpu.memory_space<vmem>>, vector<36x128xf32>
    %cst = arith.constant dense<0.000000e+00> : vector<256x128xf32>
    %2 = tpu.matmul %0, %1, %cst {dimension_numbers = #tpu.dot_dimension_numbers<[1], [0], [0], [1], [0, 0, 1, 1], [], []>} : vector<256x36xf32>, vector<36x128xf32>, vector<256x128xf32> -> vector<256x128xf32>
    %c0_3 = arith.constant 0 : index
    %c0_4 = arith.constant 0 : index
    %3 = vector.load %arg3[%c0_3, %c0_4] : memref<256x128xf32, #tpu.memory_space<vmem>>, vector<256x128xf32>
    tpu.vector_store %arg3[%c0_3, %c0_4], %2 {strides = array<i32>} : memref<256x128xf32, #tpu.memory_space<vmem>>, vector<256x128xf32>,
    %c0_i32 = arith.constant 0 : i32
    %4 = arith.cmpi eq, %arg0, %c0_i32 : i32
    %5 = arith.extui %4 : i1 to i32
    %c0_i32_5 = arith.constant 0 : i32
    %6 = arith.cmpi ne, %5, %c0_i32_5 : i32
    scf.if %6 {
      %cst_12 = arith.constant 0.000000e+00 : f32
      %16 = vector.broadcast %cst_12 : f32 to vector<2x128xf32>
      %c0_13 = arith.constant 0 : index
      %c0_14 = arith.constant 0 : index
      %17 = vector.load %arg4[%c0_13, %c0_14] : memref<2x128xf32, #tpu.memory_space<vmem>>, vector<2x128xf32>
      tpu.vector_store %arg4[%c0_13, %c0_14], %16 {strides = array<i32>} : memref<2x128xf32, #tpu.memory_space<vmem>>, vector<2x128xf32>,
    } else {
    }
    %cst_6 = arith.constant dense<0.000000e+00> : vector<128xf32>
    %7 = vector.multi_reduction <add>, %2, %cst_6 [0] : vector<256x128xf32> to vector<128xf32>
    %8 = vector.shape_cast %7 : vector<128xf32> to vector<1x128xf32>
    %9 = arith.mulf %2, %2 : vector<256x128xf32>
    %cst_7 = arith.constant dense<0.000000e+00> : vector<128xf32>
    %10 = vector.multi_reduction <add>, %9, %cst_7 [0] : vector<256x128xf32> to vector<128xf32>
    %11 = vector.shape_cast %10 : vector<128xf32> to vector<1x128xf32>
    %c0_8 = arith.constant 0 : index
    %c0_9 = arith.constant 0 : index
    %12 = vector.load %arg4[%c0_8, %c0_9] : memref<2x128xf32, #tpu.memory_space<vmem>>, vector<2x128xf32>
    %13 = tpu.concatenate %8, %11 in 0 : vector<1x128xf32>, vector<1x128xf32> -> vector<2x128xf32>
    %14 = arith.addf %12, %13 : vector<2x128xf32>
    %c0_10 = arith.constant 0 : index
    %c0_11 = arith.constant 0 : index
    %15 = vector.load %arg4[%c0_10, %c0_11] : memref<2x128xf32, #tpu.memory_space<vmem>>, vector<2x128xf32>
    tpu.vector_store %arg4[%c0_10, %c0_11], %14 {strides = array<i32>} : memref<2x128xf32, #tpu.memory_space<vmem>>, vector<2x128xf32>,
    return
  }
  func.func @transform_0(%arg0: i32) -> (i32, i32) {
    %c0_i32 = arith.constant 0 : i32
    %c0_i32_0 = arith.constant 0 : i32
    return %arg0, %c0_i32 : i32, i32
  }
  func.func @transform_1(%arg0: i32) -> (i32, i32) {
    %c0_i32 = arith.constant 0 : i32
    %c0_i32_0 = arith.constant 0 : i32
    %c0_i32_1 = arith.constant 0 : i32
    return %c0_i32, %c0_i32_0 : i32, i32
  }
  func.func @transform_2(%arg0: i32) -> (i32, i32) {
    %c0_i32 = arith.constant 0 : i32
    %c0_i32_0 = arith.constant 0 : i32
    return %arg0, %c0_i32 : i32, i32
  }
  func.func @transform_3(%arg0: i32) -> (i32, i32) {
    %c0_i32 = arith.constant 0 : i32
    %c0_i32_0 = arith.constant 0 : i32
    %c0_i32_1 = arith.constant 0 : i32
    return %c0_i32, %c0_i32_0 : i32, i32
  }
}

</mosaic_0001>

<bundles_post_ra>
// kernel: tpu_custom_call.1
= control target key start
LH: loop header
LB: loop body
LE: loop exit
PB: predicated region body
PF: predicated region fallthrough
CT: control target
= control target key end

     0   :  { %9 = vsyncpa [#allocation3], 0  ;;  %s1283_s0 = inlined_call_operand.vmem [shape: f32[512,36], index: 0, kind: input, shape index: {}]   ;;  %s1284_s1 = inlined_call_operand.vmem [shape: f32[36,128], index: 1, kind: input, shape index: {}]   ;;  %s1285_s2 = inlined_call_operand.hbm [shape: f32[512,128], index: 2, kind: output, shape index: {0}]   ;;  %s1286_s3 = inlined_call_operand.hbm [shape: f32[2,128], index: 3, kind: output, shape index: {1}]  }
   0x1   :  { %11 = vsyncpa [#allocation3 + $0x1], 0 }
   0x2   :  { %12 = vsyncpa [#allocation5], 0  ;;  %s905_s12 = smov 0   ;;  %s907_s13 = smov 0  }
   0x3   :  { %s909_s14 = smov 0   ;;  %s911_s15 = smov 0  }
   0x4 LB: > { %s926_s16 = sadd.s32 4294967295, %s879_s15   ;;  %s672_s17 = sadd.s32 4294967294, %s879_s15   ;;  %s879_s15 = sphi %s911_s15, %s1292_s15   ;;  %s875_s14 = sphi %s909_s14, %s1291_s14   ;;  %s871_s13 = sphi %s907_s13, %s1290_s13   ;;  %s867_s12 = sphi %s905_s12, %s1289_s12  }
   0x5   : > { %s930_s18 = sadd.s32 1, %s879_s15   ;;  %s72_s19 = sadd.s32 1, %s875_s14 }
   0x6   : > { %s69_s20 = ssub.s32 %s879_s15, %s930_s18  ;;  %p82_p0 = scmp.ne.s32.totalorder %s875_s14, %s871_s13 }
   0x7   : > { %p70_p1 = scmp.eq.s32.totalorder %s69_s20, 0  ;;  %p83_p2 = scmp.eq.s32.totalorder %s926_s16, 1 }
   0x8   : > { %p88_p3 = scmp.ne.s32.totalorder %s871_s13, %s867_s12  ;;  %p89_p4 = scmp.eq.s32.totalorder %s672_s17, 1 }
   0x9   : > { %s941_s21 = scalar_select %p70_p1, %s875_s14, %s72_s19  }
   0xa   : > { %p945_p5 = por %p83_p2, %p82_p0  ;;  %p949_p6 = por %p89_p4, %p88_p3 }
   0xb   : > { %p675_p7 = scmp.ge.s32.totalorder %s879_s15, 1  ;;  %p140_p8 = scmp.lt.s32.totalorder %s879_s15, 3 }
   0xd   : > { %p141_p9 = pnand %p675_p7, %p140_p8 }
   0xe   : > { %s677_s28 = sshll.u32 (!%p141_p9), %s926_s16, 5  ;;  %s159_s17 = sand.u32 (!%p141_p9), 1, %s871_s13  }
   0xf   : > { %144 = sbr.rel (%p141_p9) target bundleno = 315 (0x13b), region = 28  ;;  %p165_p10 = scmp.lt.s32.totalorder (!%p141_p9), %s677_s28, 63 }
  0x10   : > { %s676_s19 = sshll.u32 (!%p141_p9), %s159_s17, 8  ;;  %p712_p11 = scmp.ne.s32.totalorder (!%p141_p9), %s926_s16, 0 }
  0x11   : > { %s1047_s20 = scalar_lea.vmem (!%p141_p9), [#allocation2], %s676_s19 }
  0x14   : > { %v207_v0 = vld [vmem:[%s1284_s1 + $0x20] sm:$0xf]  ;;  %vm305_vm0 = vcmask 1043456   ;;  %v206_v1 = vld [vmem:[%s1284_s1 + $0x18] sm:$0xff]  ;;  %v205_v2 = vld [vmem:[%s1284_s1 + $0x10] sm:$0xff]  ;;  %s1294_s28 = smov (!%p165_p10, %s677_s28), 63 }
  0x15   : > { %722 = vmatpush.msk.msra.mxu2 %vm305_vm0, %v207_v0  ;;  %723 = vmatpush.msk.msra.mxu3 %vm305_vm0, %v207_v0  ;;  %v204_v3 = vld [vmem:[%s1284_s1 + $0x8] sm:$0xff]  ;;  %s678_s6 = sshll.u32 %s1294_s28, 3  ;;  %v203_v4 = vld [vmem:[%s1284_s1] sm:$0xff]  ;;  %vm208_vm1 = vcmask 293888  }
  0x16   : > { %679 = vmatpush.msk.msra.mxu0 %vm305_vm0, %v207_v0  ;;  %721 = vmatpush.msk.msra.mxu1 %vm305_vm0, %v207_v0  ;;  %s974_s11 = scalar_lea.vmem %s1283_s0, %s678_s6 }
  0x17   : > { %725 = vmatpush.msra.mxu2 %v206_v1  ;;  %726 = vmatpush.msra.mxu3 %v206_v1  ;;  %v187_v5 = vld [vmem:[%s974_s11 + $0x80] sm:$0xff]  ;;  %v188_v9 = vld [vmem:[%s974_s11 + $0x88] sm:$0xff]  ;;  %v189_v13 = vld [vmem:[%s974_s11 + $0x90] sm:$0xff] }
  0x18   : > { %321 = vmatpush.msra.mxu0 %v206_v1  ;;  %724 = vmatpush.msra.mxu1 %v206_v1  ;;  %v195_v6 = vld [vmem:[%s974_s11 + $0xc0] sm:$0xff]  ;;  %v196_v10 = vld [vmem:[%s974_s11 + $0xc8] sm:$0xff]  ;;  %v197_v14 = vld [vmem:[%s974_s11 + $0xd0] sm:$0xff] }
  0x19   : > { %728 = vmatpush.msra.mxu2 %v205_v2  ;;  %729 = vmatpush.msra.mxu3 %v205_v2  ;;  %v171_v7 = vld [vmem:[%s974_s11] sm:$0xff]  ;;  %v172_v11 = vld [vmem:[%s974_s11 + $0x8] sm:$0xff]  ;;  %v173_v15 = vld [vmem:[%s974_s11 + $0x10] sm:$0xff] }
  0x1a   : > { %322 = vmatpush.msra.mxu0 %v205_v2  ;;  %727 = vmatpush.msra.mxu1 %v205_v2  ;;  %v179_v8 = vld [vmem:[%s974_s11 + $0x40] sm:$0xff]  ;;  %v180_v12 = vld [vmem:[%s974_s11 + $0x48] sm:$0xff]  ;;  %v181_v16 = vld [vmem:[%s974_s11 + $0x50] sm:$0xff] }
  0x1b   : > { %731 = vmatpush.msra.mxu2 %v204_v3  ;;  %732 = vmatpush.msra.mxu3 %v204_v3  ;;  %v190_v17 = vld [vmem:[%s974_s11 + $0x98] sm:$0xff]  ;;  %v191_v21 = vld [vmem:[%s974_s11 + $0xa0] sm:$0xff]  ;;  %v192_v25 = vld [vmem:[%s974_s11 + $0xa8] sm:$0xff] }
  0x1c   : > { %323 = vmatpush.msra.mxu0 %v204_v3  ;;  %730 = vmatpush.msra.mxu1 %v204_v3  ;;  %v198_v18 = vld [vmem:[%s974_s11 + $0xd8] sm:$0xff]  ;;  %v199_v22 = vld [vmem:[%s974_s11 + $0xe0] sm:$0xff]  ;;  %v200_v26 = vld [vmem:[%s974_s11 + $0xe8] sm:$0xff] }
  0x1d   : > { %734 = vmatpush.msra.mxu2 %v203_v4  ;;  %735 = vmatpush.msra.mxu3 %v203_v4  ;;  %v174_v19 = vld [vmem:[%s974_s11 + $0x18] sm:$0xff]  ;;  %v175_v23 = vld [vmem:[%s974_s11 + $0x20] sm:$0xff]  ;;  %v176_v27 = vld [vmem:[%s974_s11 + $0x28] sm:$0xff] }
  0x1e   : > { %696 = vmatmul.msk.f32.vlgmr.msra.gmra.mxu2 %vm208_vm1, %v187_v5  ;;  %704 = vmatmul.msk.f32.vlgmr.msra.gmra.mxu3 %vm208_vm1, %v195_v6  ;;  %v182_v20 = vld [vmem:[%s974_s11 + $0x58] sm:$0xff]  ;;  %v183_v24 = vld [vmem:[%s974_s11 + $0x60] sm:$0xff]  ;;  %v184_v28 = vld [vmem:[%s974_s11 + $0x68] sm:$0xff] }
  0x1f   : > { %324 = vmatpush.msra.mxu0 %v203_v4  ;;  %733 = vmatpush.msra.mxu1 %v203_v4  ;;  %v193_v29 = vld [vmem:[%s974_s11 + $0xb0] sm:$0xff]  ;;  %v194_v33 = vld [vmem:[%s974_s11 + $0xb8] sm:$0xff] }
  0x20   : > { %680 = vmatmul.msk.f32.vlgmr.msra.gmra.mxu0 %vm208_vm1, %v171_v7  ;;  %688 = vmatmul.msk.f32.vlgmr.msra.gmra.mxu1 %vm208_vm1, %v179_v8  ;;  %v201_v30 = vld [vmem:[%s974_s11 + $0xf0] sm:$0xff]  ;;  %v202_v34 = vld [vmem:[%s974_s11 + $0xf8] sm:$0xff] }
  0x21   : > { %v177_v31 = vld [vmem:[%s974_s11 + $0x30] sm:$0xff]  ;;  %v178_v35 = vld [vmem:[%s974_s11 + $0x38] sm:$0xff] }
  0x22   : > { %v185_v32 = vld [vmem:[%s974_s11 + $0x70] sm:$0xff]  ;;  %v186_v36 = vld [vmem:[%s974_s11 + $0x78] sm:$0xff] }
  0x26   : > { %697 = vmatmul.msk.f32.gmra.mxu2 %vm208_vm1, %v188_v9  ;;  %705 = vmatmul.msk.f32.gmra.mxu3 %vm208_vm1, %v196_v10 }
  0x28   : > { %681 = vmatmul.msk.f32.gmra.mxu0 %vm208_vm1, %v172_v11  ;;  %689 = vmatmul.msk.f32.gmra.mxu1 %vm208_vm1, %v180_v12 }
  0x2e   : > { %698 = vmatmul.msk.f32.gmra.mxu2 %vm208_vm1, %v189_v13  ;;  %706 = vmatmul.msk.f32.gmra.mxu3 %vm208_vm1, %v197_v14 }
  0x30   : > { %682 = vmatmul.msk.f32.gmra.mxu0 %vm208_vm1, %v173_v15  ;;  %690 = vmatmul.msk.f32.gmra.mxu1 %vm208_vm1, %v181_v16 }
  0x36   : > { %699 = vmatmul.msk.f32.gmra.mxu2 %vm208_vm1, %v190_v17  ;;  %707 = vmatmul.msk.f32.gmra.mxu3 %vm208_vm1, %v198_v18 }
  0x38   : > { %683 = vmatmul.msk.f32.gmra.mxu0 %vm208_vm1, %v174_v19  ;;  %691 = vmatmul.msk.f32.gmra.mxu1 %vm208_vm1, %v182_v20 }
  0x3e   : > { %700 = vmatmul.msk.f32.gmra.mxu2 %vm208_vm1, %v191_v21  ;;  %708 = vmatmul.msk.f32.gmra.mxu3 %vm208_vm1, %v199_v22 }
  0x40   : > { %684 = vmatmul.msk.f32.gmra.mxu0 %vm208_vm1, %v175_v23  ;;  %692 = vmatmul.msk.f32.gmra.mxu1 %vm208_vm1, %v183_v24 }
  0x46   : > { %701 = vmatmul.msk.f32.gmra.mxu2 %vm208_vm1, %v192_v25  ;;  %709 = vmatmul.msk.f32.gmra.mxu3 %vm208_vm1, %v200_v26 }
  0x48   : > { %685 = vmatmul.msk.f32.gmra.mxu0 %vm208_vm1, %v176_v27  ;;  %693 = vmatmul.msk.f32.gmra.mxu1 %vm208_vm1, %v184_v28 }
  0x4e   : > { %702 = vmatmul.msk.f32.gmra.mxu2 %vm208_vm1, %v193_v29  ;;  %710 = vmatmul.msk.f32.gmra.mxu3 %vm208_vm1, %v201_v30 }
  0x50   : > { %686 = vmatmul.msk.f32.gmra.mxu0 %vm208_vm1, %v177_v31  ;;  %694 = vmatmul.msk.f32.gmra.mxu1 %vm208_vm1, %v185_v32 }
  0x56   : > { %703 = vmatmul.msk.f32.gmra.mxu2 %vm208_vm1, %v194_v33  ;;  %711 = vmatmul.msk.f32.gmra.mxu3 %vm208_vm1, %v202_v34 }
  0x58   : > { %687 = vmatmul.msk.f32.gmra.mxu0 %vm208_vm1, %v178_v35  ;;  %695 = vmatmul.msk.f32.gmra.mxu1 %vm208_vm1, %v186_v36 }
  0x9d   : > { %v1043_v37 = vpop.f32.mrf.mxu0  ;;  %v1045_v38 = vpop.f32.mrf.mxu1 }
  0x9e   : > { %422 = vst [vmem:[%s1047_s20] sm:$0xff] %v1043_v37 }
  0x9f   : > { %430 = vst [vmem:[%s1047_s20 + $0x40] sm:$0xff] %v1045_v38 }
  0xa1   : > { %v1053_v39 = vpop.f32.mrf.mxu2  ;;  %v1055_v40 = vpop.f32.mrf.mxu3 }
  0xa2   : > { %438 = vst [vmem:[%s1047_s20 + $0x80] sm:$0xff] %v1053_v39 }
  0xa3   : > { %446 = vst [vmem:[%s1047_s20 + $0xc0] sm:$0xff] %v1055_v40 }
  0xa5   : > { %v1061_v41 = vpop.f32.mrf.mxu0  ;;  %v1063_v42 = vpop.f32.mrf.mxu1 }
  0xa6   : > { %423 = vst [vmem:[%s1047_s20 + $0x8] sm:$0xff] %v1061_v41 }
  0xa7   : > { %431 = vst [vmem:[%s1047_s20 + $0x48] sm:$0xff] %v1063_v42 }
  0xa9   : > { %v1069_v43 = vpop.f32.mrf.mxu2  ;;  %v1071_v44 = vpop.f32.mrf.mxu3 }
  0xaa   : > { %439 = vst [vmem:[%s1047_s20 + $0x88] sm:$0xff] %v1069_v43 }
  0xab   : > { %447 = vst [vmem:[%s1047_s20 + $0xc8] sm:$0xff] %v1071_v44 }
  0xad   : > { %v332_v45 = vpop.f32.mrf.mxu0  ;;  %v1077_v46 = vpop.f32.mrf.mxu1 }
  0xae   : > { %424 = vst [vmem:[%s1047_s20 + $0x10] sm:$0xff] %v332_v45 }
  0xaf   : > { %432 = vst [vmem:[%s1047_s20 + $0x50] sm:$0xff] %v1077_v46 }
  0xb1   : > { %v1082_v47 = vpop.f32.mrf.mxu2  ;;  %v1084_v48 = vpop.f32.mrf.mxu3 }
  0xb2   : > { %440 = vst [vmem:[%s1047_s20 + $0x90] sm:$0xff] %v1082_v47 }
  0xb3   : > { %448 = vst [vmem:[%s1047_s20 + $0xd0] sm:$0xff] %v1084_v48 }
  0xb5   : > { %v335_v49 = vpop.f32.mrf.mxu0  ;;  %v1090_v50 = vpop.f32.mrf.mxu1 }
  0xb6   : > { %425 = vst [vmem:[%s1047_s20 + $0x18] sm:$0xff] %v335_v49 }
  0xb7   : > { %433 = vst [vmem:[%s1047_s20 + $0x58] sm:$0xff] %v1090_v50 }
  0xb9   : > { %v1095_v51 = vpop.f32.mrf.mxu2  ;;  %v1097_v52 = vpop.f32.mrf.mxu3 }
  0xba   : > { %441 = vst [vmem:[%s1047_s20 + $0x98] sm:$0xff] %v1095_v51 }
  0xbb   : > { %449 = vst [vmem:[%s1047_s20 + $0xd8] sm:$0xff] %v1097_v52 }
  0xbd   : > { %v1103_v53 = vpop.f32.mrf.mxu0  ;;  %v1105_v54 = vpop.f32.mrf.mxu1 }
  0xbe   : > { %426 = vst [vmem:[%s1047_s20 + $0x20] sm:$0xff] %v1103_v53 }
  0xbf   : > { %434 = vst [vmem:[%s1047_s20 + $0x60] sm:$0xff] %v1105_v54 }
  0xc1   : > { %v1111_v55 = vpop.f32.mrf.mxu2  ;;  %v1113_v56 = vpop.f32.mrf.mxu3 }
  0xc2   : > { %442 = vst [vmem:[%s1047_s20 + $0xa0] sm:$0xff] %v1111_v55 }
  0xc3   : > { %450 = vst [vmem:[%s1047_s20 + $0xe0] sm:$0xff] %v1113_v56 }
  0xc5   : > { %v341_v57 = vpop.f32.mrf.mxu0  ;;  %v1119_v58 = vpop.f32.mrf.mxu1 }
  0xc6   : > { %427 = vst [vmem:[%s1047_s20 + $0x28] sm:$0xff] %v341_v57 }
  0xc7   : > { %435 = vst [vmem:[%s1047_s20 + $0x68] sm:$0xff] %v1119_v58 }
  0xc9   : > { %v1124_v59 = vpop.f32.mrf.mxu2  ;;  %v1126_v60 = vpop.f32.mrf.mxu3 }
  0xca   : > { %443 = vst [vmem:[%s1047_s20 + $0xa8] sm:$0xff] %v1124_v59 }
  0xcb   : > { %451 = vst [vmem:[%s1047_s20 + $0xe8] sm:$0xff] %v1126_v60 }
  0xcd   : > { %v344_v61 = vpop.f32.mrf.mxu0  ;;  %v1132_v62 = vpop.f32.mrf.mxu1 }
  0xce   : > { %428 = vst [vmem:[%s1047_s20 + $0x30] sm:$0xff] %v344_v61 }
  0xcf   : > { %436 = vst [vmem:[%s1047_s20 + $0x70] sm:$0xff] %v1132_v62 }
  0xd1   : > { %v1137_v63 = vpop.f32.mrf.mxu2  ;;  %v1139_v0 = vpop.f32.mrf.mxu3 }
  0xd2   : > { %444 = vst [vmem:[%s1047_s20 + $0xb0] sm:$0xff] %v1137_v63 }
  0xd3   : > { %452 = vst [vmem:[%s1047_s20 + $0xf0] sm:$0xff] %v1139_v0 }
  0xd5   : > { %v347_v1 = vpop.f32.mrf.mxu0  ;;  %v1145_v2 = vpop.f32.mrf.mxu1 }
  0xd6   : > { %429 = vst [vmem:[%s1047_s20 + $0x38] sm:$0xff] %v347_v1 }
  0xd7   : > { %437 = vst [vmem:[%s1047_s20 + $0x78] sm:$0xff] %v1145_v2  ;;  %457 = sbr.rel (%p712_p11) target bundleno = 222 (0xde), region = 32 }
  0xd9   : > { %v1150_v3 = vpop.f32.mrf.mxu2  ;;  %v1152_v4 = vpop.f32.mrf.mxu3 }
  0xda   : > { %445 = vst [vmem:[%s1047_s20 + $0xb8] sm:$0xff] %v1150_v3 }
  0xdb   : > { %453 = vst [vmem:[%s1047_s20 + $0xf8] sm:$0xff] %v1152_v4 }
  0xdc   : > { %v881_v5 = vmov 0.0  }
  0xdd   : > { %458 = vst [vmem:[#allocation4] sm:$0x3] %v881_v5 }
  0xde PF: > { %v459_v6 = vadd.f32 %v1061_v41, %v1043_v37  ;;  %s720_s24 = sshll.u32 %s926_s16, 8  ;;  %v496_v7 = vmul.f32 %v1043_v37, %v1043_v37  ;;  %v497_v8 = vmul.f32 %v1061_v41, %v1061_v41  ;;  %s583_s28 = sshll.u32 %s1047_s20, 4  ;;  %v498_v10 = vmul.f32 %v332_v45, %v332_v45  ;;  %s584_s28 = int_to_ptr.vmem [resolvable:$true] %s583_s28 }
  0xdf   : > { %s582_s27 = scalar_lea.hbm %s1285_s2, %s720_s24  ;;  %v499_v12 = vmul.f32 %v335_v49, %v335_v49  ;;  %s571_s30 = scalar_lea.sflag [#allocation3], %s159_s17 }
  0xe0   : > { %v460_v9 = vadd.f32 %v459_v6, %v332_v45  ;;  %s585_s29 = sshll.u32 %s582_s27, 4  ;;  %v528_v13 = vadd.f32 %v497_v8, %v496_v7  ;;  %s805_s8 = scalar_lea.hbm %s1285_s2, 512  ;;  %s586_s29 = int_to_ptr.hbm [resolvable:$true] %s585_s29 }
  0xe1   : > { %s799_s4 = sshra.s32 %s586_s29, 4  ;;  %s800_s4 = int_to_ptr.hbm [resolvable:$true] %s799_s4 }
  0xe2   : > { %v461_v11 = vadd.f32 %v460_v9, %v335_v49  ;;  %s801_s5 = scalar_lea.hbm %s800_s4, 256  ;;  %p806_p1 = scmp.lt.s32.totalorder %s800_s4, %s1285_s2 }
  0xe3   : > { %p802_p12 = scmp.ne.s32.totalorder %s800_s4, %s801_s5  ;;  %p807_p3 = scmp.lt.s32.totalorder %s805_s8, %s801_s5 }
  0xe5   : > { %p803_p13 = pnand %p802_p12, %p945_p5  ;;  %p808_p4 = por %p807_p3, %p806_p1 }
  0xe7   : > { %p804_p0 = pneg %p803_p13 }
  0xe9   : > { %p809_p7 = pnand %p808_p4, %p804_p0 }
  0xeb   : > { %812 = shalt.err (!%p809_p7)
}
  0xec   : > { %s882_s11 = smov 128   ;;  %s883_s17 = smov 8   ;;  %v462_v14 = vadd.f32 %v461_v11, %v1103_v53  ;;  %v500_v15 = vmul.f32 %v1103_v53, %v1103_v53  ;;  %v529_v16 = vadd.f32 %v528_v13, %v498_v10  ;;  %v501_v18 = vmul.f32 %v341_v57, %v341_v57 }
  0xed   : > { %736 = dma.vmem_to_hbm [thread:$0]  (%p945_p5), %s584_s28, 4096, %s586_s29, %s571_s30, %s882_s11, %s882_s11, %s883_s17   ;;  %v502_v21 = vmul.f32 %v344_v61, %v344_v61  ;;  %v503_v24 = vmul.f32 %v347_v1, %v347_v1  ;;  %v504_v27 = vmul.f32 %v1045_v38, %v1045_v38  ;;  %v505_v30 = vmul.f32 %v1063_v42, %v1063_v42 }
  0xee   : > { %v463_v17 = vadd.f32 %v462_v14, %v341_v57  ;;  %v530_v19 = vadd.f32 %v529_v16, %v499_v12  ;;  %v506_v33 = vmul.f32 %v1077_v46, %v1077_v46  ;;  %v507_v36 = vmul.f32 %v1090_v50, %v1090_v50  ;;  %s884_s22 = smov [#allocation4]   ;;  %s600_s25 = sshll.u32 %s1286_s3, 4  ;;  %s601_s25 = int_to_ptr.hbm [resolvable:$true] %s600_s25 }
  0xef   : > { %v508_v41 = vmul.f32 %v1105_v54, %v1105_v54  ;;  %v509_v49 = vmul.f32 %v1119_v58, %v1119_v58  ;;  %v510_v57 = vmul.f32 %v1132_v62, %v1132_v62  ;;  %v512_v6 = vmul.f32 %v1053_v39, %v1053_v39  ;;  %s598_s19 = sshll.u32 %s884_s22, 4  ;;  %s599_s19 = int_to_ptr.vmem [resolvable:$true] %s598_s19 }
  0xf0   : > { %v464_v20 = vadd.f32 %v463_v17, %v344_v61  ;;  %v531_v22 = vadd.f32 %v530_v19, %v500_v15  ;;  %v513_v8 = vmul.f32 %v1069_v43, %v1069_v43  ;;  %v514_v10 = vmul.f32 %v1082_v47, %v1082_v47 }
  0xf1   : > { %v515_v12 = vmul.f32 %v1095_v51, %v1095_v51  ;;  %v516_v14 = vmul.f32 %v1111_v55, %v1111_v55  ;;  %v517_v16 = vmul.f32 %v1124_v59, %v1124_v59  ;;  %vm566_vm2 = vcmask 1040384  }
  0xf2   : > { %v465_v23 = vadd.f32 %v464_v20, %v347_v1  ;;  %v532_v25 = vadd.f32 %v531_v22, %v501_v18  ;;  %v511_v1 = vmul.f32 %v1145_v2, %v1145_v2  ;;  %v518_v18 = vmul.f32 %v1137_v63, %v1137_v63 }
  0xf3   : > { %v519_v20 = vmul.f32 %v1150_v3, %v1150_v3  ;;  %v520_v22 = vmul.f32 %v1055_v40, %v1055_v40 }
  0xf4   : > { %v466_v26 = vadd.f32 %v465_v23, %v1045_v38  ;;  %v533_v28 = vadd.f32 %v532_v25, %v502_v21 }
  0xf6   : > { %v467_v29 = vadd.f32 %v466_v26, %v1063_v42  ;;  %v534_v31 = vadd.f32 %v533_v28, %v503_v24  ;;  %v521_v24 = vmul.f32 %v1071_v44, %v1071_v44  ;;  %v522_v26 = vmul.f32 %v1084_v48, %v1084_v48 }
  0xf7   : > { %v523_v28 = vmul.f32 %v1097_v52, %v1097_v52 }
  0xf8   : > { %v468_v32 = vadd.f32 %v467_v29, %v1077_v46  ;;  %v535_v34 = vadd.f32 %v534_v31, %v504_v27 }
  0xfa   : > { %v469_v35 = vadd.f32 %v468_v32, %v1090_v50  ;;  %v536_v37 = vadd.f32 %v535_v34, %v505_v30  ;;  %v524_v30 = vmul.f32 %v1113_v56, %v1113_v56  ;;  %v525_v32 = vmul.f32 %v1126_v60, %v1126_v60 }
  0xfb   : > { %v526_v34 = vmul.f32 %v1139_v0, %v1139_v0 }
  0xfc   : > { %v470_v38 = vadd.f32 %v469_v35, %v1105_v54  ;;  %v537_v45 = vadd.f32 %v536_v37, %v506_v33 }
  0xfe   : > { %v471_v42 = vadd.f32 %v470_v38, %v1119_v58  ;;  %v538_v53 = vadd.f32 %v537_v45, %v507_v36  ;;  %v527_v36 = vmul.f32 %v1152_v4, %v1152_v4 }
 0x100   : > { %v472_v46 = vadd.f32 %v471_v42, %v1132_v62  ;;  %v539_v61 = vadd.f32 %v538_v53, %v508_v41 }
 0x102   : > { %v473_v50 = vadd.f32 %v472_v46, %v1145_v2  ;;  %v540_v5 = vadd.f32 %v539_v61, %v509_v49 }
 0x104   : > { %v474_v54 = vadd.f32 %v473_v50, %v1053_v39  ;;  %v541_v7 = vadd.f32 %v540_v5, %v510_v57  ;;  %v565_v5 = vld [vmem:[#allocation4] sm:$0x3] }
 0x106   : > { %v475_v58 = vadd.f32 %v474_v54, %v1069_v43  ;;  %v542_v9 = vadd.f32 %v541_v7, %v511_v1 }
 0x108   : > { %v476_v62 = vadd.f32 %v475_v58, %v1082_v47  ;;  %v543_v11 = vadd.f32 %v542_v9, %v512_v6 }
 0x10a   : > { %v477_v2 = vadd.f32 %v476_v62, %v1095_v51  ;;  %v544_v13 = vadd.f32 %v543_v11, %v513_v8 }
 0x10c   : > { %v478_v39 = vadd.f32 %v477_v2, %v1111_v55  ;;  %v545_v15 = vadd.f32 %v544_v13, %v514_v10 }
 0x10e   : > { %v479_v43 = vadd.f32 %v478_v39, %v1124_v59  ;;  %v546_v17 = vadd.f32 %v545_v15, %v515_v12 }
 0x110   : > { %v480_v47 = vadd.f32 %v479_v43, %v1137_v63  ;;  %v547_v19 = vadd.f32 %v546_v17, %v516_v14 }
 0x112   : > { %v481_v51 = vadd.f32 %v480_v47, %v1150_v3  ;;  %v548_v21 = vadd.f32 %v547_v19, %v517_v16 }
 0x114   : > { %v482_v55 = vadd.f32 %v481_v51, %v1055_v40  ;;  %v549_v23 = vadd.f32 %v548_v21, %v518_v18 }
 0x116   : > { %v483_v59 = vadd.f32 %v482_v55, %v1071_v44  ;;  %v550_v25 = vadd.f32 %v549_v23, %v519_v20 }
 0x118   : > { %v484_v63 = vadd.f32 %v483_v59, %v1084_v48  ;;  %v551_v27 = vadd.f32 %v550_v25, %v520_v22 }
 0x11a   : > { %v485_v3 = vadd.f32 %v484_v63, %v1097_v52  ;;  %v552_v29 = vadd.f32 %v551_v27, %v521_v24 }
 0x11c   : > { %v486_v40 = vadd.f32 %v485_v3, %v1113_v56  ;;  %v553_v31 = vadd.f32 %v552_v29, %v522_v26 }
 0x11e   : > { %v487_v44 = vadd.f32 %v486_v40, %v1126_v60  ;;  %v554_v33 = vadd.f32 %v553_v31, %v523_v28 }
 0x120   : > { %v488_v48 = vadd.f32 %v487_v44, %v1139_v0  ;;  %v555_v35 = vadd.f32 %v554_v33, %v524_v30 }
 0x122   : > { %v489_v52 = vadd.f32 %v488_v48, %v1152_v4  ;;  %v556_v37 = vadd.f32 %v555_v35, %v525_v32 }
 0x124   : > { %v490_v56 = vrot.slane %v489_v52, 4  ;;  %v557_v38 = vadd.f32 %v556_v37, %v526_v34 }
 0x126   : > { %v491_v41 = vadd.f32 %v490_v56, %v489_v52  ;;  %v558_v45 = vadd.f32 %v557_v38, %v527_v36 }
 0x128   : > { %v492_v42 = vrot.slane %v491_v41, 2  ;;  %v559_v49 = vrot.slane %v558_v45, 4 }
 0x12a   : > { %v493_v60 = vadd.f32 %v492_v42, %v491_v41  ;;  %v560_v53 = vadd.f32 %v559_v49, %v558_v45 }
 0x12c   : > { %v494_v46 = vrot.slane %v493_v60, 1  ;;  %v561_v57 = vrot.slane %v560_v53, 2 }
 0x12e   : > { %v562_v0 = vadd.f32 %v561_v57, %v560_v53  ;;  %v495_v61 = vadd.f32 %v494_v46, %v493_v60 }
 0x130   : > { %v563_v50 = vrot.slane %v562_v0, 1 }
 0x132   : > { %v564_v1 = vadd.f32 %v563_v50, %v562_v0 }
 0x134   : > { %v567_v4 = vsel %vm566_vm2, %v495_v61, %v564_v1 }
 0x135   : > { %v568_v54 = vadd.f32 %v567_v4, %v565_v5 }
 0x137   : > { %569 = vst [vmem:[#allocation4] sm:$0x3] %v568_v54 }
 0x138   : > { %738 = dma.vmem_to_hbm [thread:$0]  (%p83_p2), %s599_s19, 32, %s601_s25, [#allocation5]  }
 0x139   : > { %858 = dma.done.wait (%p83_p2), [#allocation5], 32  }
 0x13a   : > { %860 = vsyncadd (%p83_p2), [#allocation5], 4294967264 }
 0x13b PF: > { %p748_p5 = scmp.ge.s32.totalorder %s879_s15, 2  ;;  %s617_s26 = sand.u32 1, %s867_s12  }
 0x13c   : > { %s618_s27 = scalar_lea.sflag [#allocation3], %s617_s26 }
 0x13d   : > { %p743_p8 = pnand %p748_p5, %p949_p6 }
 0x13f   : > { %p744_p9 = pneg %p743_p8 }
 0x141   : > { %862 = dma.done.wait (%p744_p9), %s618_s27, 4096  }
 0x142   : > { %864 = vsyncadd (%p744_p9), %s618_s27, 4294963200  ;;  %p15_p10 = scmp.ge.s32.totalorder %s930_s18, 4   ;;  %s1289_s12 = smov %s871_s13 }
 0x143   : > { %s1290_s13 = smov %s875_s14  ;;  %s1291_s14 = smov %s941_s21 }
 0x144   : > { %s1292_s15 = smov %s930_s18  ;;  %17 = sbr.rel (!%p15_p10) target bundleno = 4 (0x4), region = 75 }
 0x149   :  { %624 = vsyncpa [#allocation3], 1 }
 0x14a   :  { %626 = vsyncpa [#allocation3 + $0x1], 1 }
 0x14b   :  { %627 = vsyncpa [#allocation5], 1 }

</bundles_post_ra>
